<compile_context>
chip_gen: v7x
topology: tpu7x:2x2x1
jax: 0.10.0
libtpu: 0.0.40
codegen_flags: <defaults>
</compile_context>

<pallas_src>
import jax
import jax.numpy as jnp
from jax.experimental import pallas as pl
from jax.experimental.pallas import tpu as pltpu

features = ['wday', 'month', 'year', 'snap_CA', 'snap_TX', 'snap_WI', 'sell_price',
            'event_name_1_filled', 'event_type_1_filled', 'sell_price_filled',
            'dept_id:HOBBIES_1', 'cat_id:HOBBIES', 'state_id:CA',
            'event_name_1:Chanukah End', 'event_name_1:Christmas', 'event_name_1:Cinco De Mayo',
            'event_name_1:ColumbusDay', 'event_name_1:Easter', 'event_name_1:Eid al-Fitr',
            'event_name_1:EidAlAdha', "event_name_1:Father's day", 'event_name_1:Halloween',
            'event_name_1:IndependenceDay', 'event_name_1:LaborDay', 'event_name_1:LentStart',
            'event_name_1:LentWeek2', 'event_name_1:MartinLutherKingDay', 'event_name_1:MemorialDay',
            "event_name_1:Mother's day", 'event_name_1:NBAFinalsEnd', 'event_name_1:NBAFinalsStart',
            'event_name_1:NewYear', 'event_name_1:OrthodoxChristmas', 'event_name_1:OrthodoxEaster',
            'event_name_1:Pesach End', 'event_name_1:PresidentsDay', 'event_name_1:Purim End',
            'event_name_1:Ramadan starts', 'event_name_1:StPatricksDay', 'event_name_1:SuperBowl',
            'event_name_1:Thanksgiving', 'event_name_1:ValentinesDay', 'event_name_1:VeteransDay',
            'event_name_1:no_event_name_1', 'event_type_1:Cultural', 'event_type_1:National',
            'event_type_1:Religious', 'event_type_1:Sporting', 'event_type_1:no_event_type_1',
            'last', 'item_store_last_day_sales', 'item_store_last_day_sales_filled',
            'item_store_L7d_day_median_sales_filled', 'item_store_L7d_day_median_sales',
            'item_store_L14d_day_median_sales_filled', 'item_store_L14d_day_median_sales',
            'item_store_L21d_day_median_sales_filled', 'item_store_L21d_day_median_sales',
            'item_store_L28d_day_median_sales_filled', 'item_store_L28d_day_median_sales']

IN_DIM = len(features)   # 60
HIDDEN = 500
OUT_DIM = 1

HID_PAD = 512            # 500 -> 4 x 128 lanes (clean MXU / lane tiles)
MAX_TILE_B = 1024        # batch tile upper bound


def _round_up(n, m):
    return (n + m - 1) // m * m


def _choose_tiling(B):
    """Pick (tile_b, B_pad). Tiles are multiples of 16 rows (bf16 native
    sublane packing for the intermediate activations); for B > 32 we always
    produce >= 2 balanced grid steps so v7x can shard the parallel batch axis
    across both TensorCores, and padding waste is spread across steps."""
    if B <= 32:
        tile_b = _round_up(max(B, 1), 16)
    else:
        n_tiles = max(2, pl.cdiv(B, MAX_TILE_B))
        tile_b = min(MAX_TILE_B, _round_up(pl.cdiv(B, n_tiles), 16))
    B_pad = _round_up(B, tile_b)
    return tile_b, B_pad


def mlp_kernel(x_ref, w1_ref, b1_ref, w2_ref, b2_ref, w3_ref, b3_ref, o_ref):
    # Layer 1: f32 (tile_b, 60) @ f32 (60, 512) on the MXU, bias + ReLU on VPU.
    h1 = jnp.dot(x_ref[...], w1_ref[...], preferred_element_type=jnp.float32)
    h1 = jnp.maximum(h1 + b1_ref[...], 0.0)
    # Layer 2 (dominant): bf16 x bf16 MXU matmul with f32 accumulation.
    h2 = jnp.dot(h1.astype(jnp.bfloat16), w2_ref[...],
                 preferred_element_type=jnp.float32)
    h2 = jnp.maximum(h2 + b2_ref[...], 0.0)
    # Layer 3: only one real output column -> VPU multiply + cross-lane reduce
    # (keeps the MXU slot free; padded hidden lanes of w3 are zero).
    o_ref[...] = (jnp.sum(h2 * w3_ref[...], axis=-1, keepdims=True)
                  + b3_ref[...])


def quantile_regression_forward(x, prepared_params):
    """x: (B, IN_DIM) float32. prepared_params: output of prepare_params.
    Returns (B, 1) float32."""
    w1, b1, w2, b2, w3, b3 = prepared_params
    B = x.shape[0]
    x = x.astype(jnp.float32)

    tile_b, B_pad = _choose_tiling(B)
    if B_pad != B:                       # cheap batch-only pad (features untouched)
        x = jnp.pad(x, ((0, B_pad - B), (0, 0)))

    grid = (B_pad // tile_b,)
    const = lambda i: (0, 0)             # weights/biases: same block every step -> resident

    cost = pl.CostEstimate(
        flops=2 * B_pad * (IN_DIM * HID_PAD + HID_PAD * HID_PAD + HID_PAD),
        transcendentals=0,
        bytes_accessed=(B_pad * IN_DIM * 4
                        + sum(int(a.size) * a.dtype.itemsize
                              for a in (w1, b1, w2, b2, w3, b3))
                        + B_pad * 4),
    )

    # TODO(synk): if xprof on v5e shows the streamed-x DMA exposed at large
    # tile_b, add pipeline_mode=pl.Buffered(3) to the x BlockSpec.
    out = pl.pallas_call(
        mlp_kernel,
        out_shape=jax.ShapeDtypeStruct((B_pad, 1), jnp.float32),
        grid=grid,
        in_specs=[
            pl.BlockSpec((tile_b, IN_DIM), lambda i: (i, 0)),   # x: streamed per tile
            pl.BlockSpec((IN_DIM, HID_PAD), const),             # w1 (resident, f32)
            pl.BlockSpec((1, HID_PAD), const),                  # b1
            pl.BlockSpec((HID_PAD, HID_PAD), const),            # w2 (resident, bf16)
            pl.BlockSpec((1, HID_PAD), const),                  # b2
            pl.BlockSpec((1, HID_PAD), const),                  # w3 (row layout, f32)
            pl.BlockSpec((1, 1), const),                        # b3
        ],
        out_specs=pl.BlockSpec((tile_b, 1), lambda i: (i, 0)),
        compiler_params=pltpu.CompilerParams(
            dimension_semantics=("parallel",)),
        cost_estimate=cost,
    )(x, w1, b1, w2, b2, w3, b3)

    return out[:B]


def init_params(key):
    """Deterministic init mimicking PyTorch Linear's U(-1/sqrt(fan_in), 1/sqrt(fan_in)).
    Returns unpadded f32 weights stored as (in, out) and biases as (1, out)."""
    ks = jax.random.split(key, 6)

    def lin(kw, kb, fan_in, fan_out):
        bound = 1.0 / jnp.sqrt(jnp.float32(fan_in))
        w = jax.random.uniform(kw, (fan_in, fan_out), jnp.float32, -bound, bound)
        b = jax.random.uniform(kb, (1, fan_out), jnp.float32, -bound, bound)
        return w, b

    w1, b1 = lin(ks[0], ks[1], IN_DIM, HIDDEN)
    w2, b2 = lin(ks[2], ks[3], HIDDEN, HIDDEN)
    w3, b3 = lin(ks[4], ks[5], HIDDEN, OUT_DIM)
    return (w1, b1, w2, b2, w3, b3)


def prepare_params(raw_params):
    """One-time prep: pad hidden 500 -> 512 with zeros, lay out w3 as a
    (1, HID_PAD) row, cast the dominant w2 to bf16 (w1/w3/biases stay f32).
    Padded lanes stay exactly zero through bias-add + ReLU, so results match
    the unpadded computation."""
    w1, b1, w2, b2, w3, b3 = raw_params
    w1p = jnp.zeros((IN_DIM, HID_PAD), jnp.float32).at[:, :HIDDEN].set(w1)
    b1p = jnp.zeros((1, HID_PAD), jnp.float32).at[:, :HIDDEN].set(b1)
    w2p = jnp.zeros((HID_PAD, HID_PAD), jnp.float32).at[:HIDDEN, :HIDDEN].set(w2)
    b2p = jnp.zeros((1, HID_PAD), jnp.float32).at[:, :HIDDEN].set(b2)
    w3p = jnp.zeros((1, HID_PAD), jnp.float32).at[:, :HIDDEN].set(w3.T)
    b3p = b3.reshape(1, 1)
    return (w1p, b1p, w2p.astype(jnp.bfloat16), b2p, w3p, b3p)


def reference_forward_matched(x, prepared_params):
    """Pure-JAX reference with the same padded layout / bf16 w2 / f32 accumulation."""
    w1, b1, w2, b2, w3, b3 = prepared_params
    hp = jax.lax.Precision.HIGHEST
    h1 = jnp.maximum(jnp.dot(x.astype(jnp.float32), w1, precision=hp) + b1, 0.0)
    h2 = jnp.maximum(jnp.dot(h1.astype(jnp.bfloat16), w2,
                             preferred_element_type=jnp.float32) + b2, 0.0)
    return jnp.sum(h2 * w3, axis=-1, keepdims=True) + b3


def reference_forward_f32(x, raw_params):
    """Full-precision f32 reference of the original PyTorch module (unpadded)."""
    w1, b1, w2, b2, w3, b3 = raw_params
    hp = jax.lax.Precision.HIGHEST
    h1 = jnp.maximum(jnp.dot(x, w1, precision=hp) + b1, 0.0)
    h2 = jnp.maximum(jnp.dot(h1, w2, precision=hp) + b2, 0.0)
    return jnp.dot(h2, w3, precision=hp) + b3


if __name__ == "__main__":
    key = jax.random.PRNGKey(0)
    k_x, k_p = jax.random.split(key)

    raw_params = init_params(k_p)
    params = prepare_params(raw_params)

    # Small batch: single grid step.
    B = 8
    x = jax.random.normal(k_x, (B, IN_DIM), dtype=jnp.float32)
    out = jax.block_until_ready(quantile_regression_forward(x, params))
    assert out.shape == (B, OUT_DIM), out.shape

    ref_m = reference_forward_matched(x, params)
    err_m = float(jnp.max(jnp.abs(out - ref_m)))
    assert err_m < 1e-2, f"max abs err vs matched ref {err_m}"

    # Loose check vs. original full-f32 module semantics (delta = bf16 w2/h1 quantization).
    ref_f = reference_forward_f32(x, raw_params)
    err_f = float(jnp.max(jnp.abs(out - ref_f)))
    assert err_f < 5e-2, f"max abs err vs f32 ref {err_f}"

    # Medium batch: exercises the multi-tile (>=2 grid steps) + batch-padding path.
    B2 = 100
    x2 = jax.random.normal(k_x, (B2, IN_DIM), dtype=jnp.float32)
    out2 = jax.block_until_ready(quantile_regression_forward(x2, params))
    assert out2.shape == (B2, OUT_DIM), out2.shape
    ref2 = reference_forward_matched(x2, params)
    err2 = float(jnp.max(jnp.abs(out2 - ref2)))
    assert err2 < 1e-2, f"max abs err (B={B2}) vs matched ref {err2}"

    print("KERNEL_OK")
</pallas_src>

<mosaic_0001>
module attributes {stable_mosaic.version = 11 : i64} {
  func.func @mlp_kernel(%arg0: i32, %arg1: memref<16x60xf32, #tpu.memory_space<vmem>>, %arg2: memref<60x512xf32, #tpu.memory_space<vmem>>, %arg3: memref<1x512xf32, #tpu.memory_space<vmem>>, %arg4: memref<512x512xbf16, #tpu.memory_space<vmem>>, %arg5: memref<1x512xf32, #tpu.memory_space<vmem>>, %arg6: memref<1x512xf32, #tpu.memory_space<vmem>>, %arg7: memref<1x1xf32, #tpu.memory_space<vmem>>, %arg8: memref<16x1xf32, #tpu.memory_space<vmem>>) attributes {dimension_semantics = [#tpu.dimension_semantics<parallel>], iteration_bounds = array<i64: 1>, scalar_prefetch = 0 : i64, scratch_operands = 0 : i64, tpu.core_type = #tpu.core_type<tc>, window_params = [{transform_indices = @transform_0, window_bounds = array<i64: 16, 60>}, {pipeline_mode = #tpu.pipeline_mode<synchronous>, transform_indices = @transform_1, window_bounds = array<i64: 60, 512>}, {pipeline_mode = #tpu.pipeline_mode<synchronous>, transform_indices = @transform_2, window_bounds = array<i64: 1, 512>}, {pipeline_mode = #tpu.pipeline_mode<synchronous>, transform_indices = @transform_3, window_bounds = array<i64: 512, 512>}, {pipeline_mode = #tpu.pipeline_mode<synchronous>, transform_indices = @transform_4, window_bounds = array<i64: 1, 512>}, {pipeline_mode = #tpu.pipeline_mode<synchronous>, transform_indices = @transform_5, window_bounds = array<i64: 1, 512>}, {pipeline_mode = #tpu.pipeline_mode<synchronous>, transform_indices = @transform_6, window_bounds = array<i64: 1, 1>}, {transform_indices = @transform_7, window_bounds = array<i64: 16, 1>}]} {
    %c0 = arith.constant 0 : index
    %c0_0 = arith.constant 0 : index
    %0 = vector.load %arg1[%c0, %c0_0] : memref<16x60xf32, #tpu.memory_space<vmem>>, vector<16x60xf32>
    %c0_1 = arith.constant 0 : index
    %c0_2 = arith.constant 0 : index
    %1 = vector.load %arg2[%c0_1, %c0_2] : memref<60x512xf32, #tpu.memory_space<vmem>>, vector<60x512xf32>
    %cst = arith.constant dense<0.000000e+00> : vector<16x512xf32>
    %2 = tpu.matmul %0, %1, %cst {dimension_numbers = #tpu.dot_dimension_numbers<[1], [0], [0], [1], [0, 0, 1, 1], [], []>} : vector<16x60xf32>, vector<60x512xf32>, vector<16x512xf32> -> vector<16x512xf32>
    %c0_3 = arith.constant 0 : index
    %c0_4 = arith.constant 0 : index
    %3 = vector.load %arg3[%c0_3, %c0_4] : memref<1x512xf32, #tpu.memory_space<vmem>>, vector<1x512xf32>
    %4 = vector.broadcast %3 : vector<1x512xf32> to vector<16x512xf32>
    %5 = arith.addf %2, %4 : vector<16x512xf32>
    %cst_5 = arith.constant 0.000000e+00 : f32
    %6 = vector.broadcast %cst_5 : f32 to vector<16x512xf32>
    %7 = arith.maximumf %5, %6 : vector<16x512xf32>
    %8 = arith.truncf %7 : vector<16x512xf32> to vector<16x512xbf16>
    %c0_6 = arith.constant 0 : index
    %c0_7 = arith.constant 0 : index
    %9 = vector.load %arg4[%c0_6, %c0_7] : memref<512x512xbf16, #tpu.memory_space<vmem>>, vector<512x512xbf16>
    %cst_8 = arith.constant dense<0.000000e+00> : vector<16x512xf32>
    %10 = tpu.matmul %8, %9, %cst_8 {dimension_numbers = #tpu.dot_dimension_numbers<[1], [0], [0], [1], [0, 0, 1, 1], [], []>} : vector<16x512xbf16>, vector<512x512xbf16>, vector<16x512xf32> -> vector<16x512xf32>
    %c0_9 = arith.constant 0 : index
    %c0_10 = arith.constant 0 : index
    %11 = vector.load %arg5[%c0_9, %c0_10] : memref<1x512xf32, #tpu.memory_space<vmem>>, vector<1x512xf32>
    %12 = vector.broadcast %11 : vector<1x512xf32> to vector<16x512xf32>
    %13 = arith.addf %10, %12 : vector<16x512xf32>
    %cst_11 = arith.constant 0.000000e+00 : f32
    %14 = vector.broadcast %cst_11 : f32 to vector<16x512xf32>
    %15 = arith.maximumf %13, %14 : vector<16x512xf32>
    %c0_12 = arith.constant 0 : index
    %c0_13 = arith.constant 0 : index
    %16 = vector.load %arg6[%c0_12, %c0_13] : memref<1x512xf32, #tpu.memory_space<vmem>>, vector<1x512xf32>
    %17 = vector.broadcast %16 : vector<1x512xf32> to vector<16x512xf32>
    %18 = arith.mulf %15, %17 : vector<16x512xf32>
    %cst_14 = arith.constant dense<0.000000e+00> : vector<16xf32>
    %19 = vector.multi_reduction <add>, %18, %cst_14 [1] : vector<16x512xf32> to vector<16xf32>
    %20 = vector.shape_cast %19 : vector<16xf32> to vector<16x1xf32>
    %c0_15 = arith.constant 0 : index
    %c0_16 = arith.constant 0 : index
    %21 = vector.load %arg7[%c0_15, %c0_16] : memref<1x1xf32, #tpu.memory_space<vmem>>, vector<1x1xf32>
    %22 = vector.broadcast %21 : vector<1x1xf32> to vector<16x1xf32>
    %23 = arith.addf %20, %22 : vector<16x1xf32>
    %c0_17 = arith.constant 0 : index
    %c0_18 = arith.constant 0 : index
    %24 = vector.load %arg8[%c0_17, %c0_18] : memref<16x1xf32, #tpu.memory_space<vmem>>, vector<16x1xf32>
    tpu.vector_store %arg8[%c0_17, %c0_18], %23 {strides = array<i32>} : memref<16x1xf32, #tpu.memory_space<vmem>>, vector<16x1xf32>,
    return
  }
  func.func @transform_0(%arg0: i32) -> (i32, i32) {
    %c0_i32 = arith.constant 0 : i32
    %c0_i32_0 = arith.constant 0 : i32
    return %arg0, %c0_i32 : i32, i32
  }
  func.func @transform_1(%arg0: i32) -> (i32, i32) {
    %c0_i32 = arith.constant 0 : i32
    %c0_i32_0 = arith.constant 0 : i32
    %c0_i32_1 = arith.constant 0 : i32
    return %c0_i32, %c0_i32_0 : i32, i32
  }
  func.func @transform_2(%arg0: i32) -> (i32, i32) {
    %c0_i32 = arith.constant 0 : i32
    %c0_i32_0 = arith.constant 0 : i32
    %c0_i32_1 = arith.constant 0 : i32
    return %c0_i32, %c0_i32_0 : i32, i32
  }
  func.func @transform_3(%arg0: i32) -> (i32, i32) {
    %c0_i32 = arith.constant 0 : i32
    %c0_i32_0 = arith.constant 0 : i32
    %c0_i32_1 = arith.constant 0 : i32
    return %c0_i32, %c0_i32_0 : i32, i32
  }
  func.func @transform_4(%arg0: i32) -> (i32, i32) {
    %c0_i32 = arith.constant 0 : i32
    %c0_i32_0 = arith.constant 0 : i32
    %c0_i32_1 = arith.constant 0 : i32
    return %c0_i32, %c0_i32_0 : i32, i32
  }
  func.func @transform_5(%arg0: i32) -> (i32, i32) {
    %c0_i32 = arith.constant 0 : i32
    %c0_i32_0 = arith.constant 0 : i32
    %c0_i32_1 = arith.constant 0 : i32
    return %c0_i32, %c0_i32_0 : i32, i32
  }
  func.func @transform_6(%arg0: i32) -> (i32, i32) {
    %c0_i32 = arith.constant 0 : i32
    %c0_i32_0 = arith.constant 0 : i32
    %c0_i32_1 = arith.constant 0 : i32
    return %c0_i32, %c0_i32_0 : i32, i32
  }
  func.func @transform_7(%arg0: i32) -> (i32, i32) {
    %c0_i32 = arith.constant 0 : i32
    %c0_i32_0 = arith.constant 0 : i32
    return %arg0, %c0_i32 : i32, i32
  }
}

</mosaic_0001>

<bundles_post_ra>
// kernel: tpu_custom_call.1
= control target key start
LH: loop header
LB: loop body
LE: loop exit
PB: predicated region body
PF: predicated region fallthrough
CT: control target
= control target key end

     0   :  { %s1951_s0 = inlined_call_operand.hbm [shape: f32[16,60], index: 0, kind: input, shape index: {}]   ;;  %s1952_s1 = inlined_call_operand.hbm [shape: f32[60,512], index: 1, kind: input, shape index: {}]   ;;  %s1953_s2 = inlined_call_operand.vmem [shape: f32[1,512], index: 2, kind: input, shape index: {}]   ;;  %s1954_s3 = inlined_call_operand.hbm [shape: bf16[512,512], index: 3, kind: input, shape index: {}]   ;;  %s1955_s4 = inlined_call_operand.vmem [shape: f32[1,512], index: 4, kind: input, shape index: {}]   ;;  %s1956_s5 = inlined_call_operand.vmem [shape: f32[1,512], index: 5, kind: input, shape index: {}]   ;;  %s1957_s6 = inlined_call_operand.<no memory space> [shape: f32[1,1], index: 6, kind: input, shape index: {}]   ;;  %s1958_s7 = inlined_call_operand.vmem [shape: f32[16,1], index: 7, kind: output, shape index: {}]  }
   0x1   :  { %v12_v0 = vstv %s1957_s6 }
   0x2   :  { %13 = vst [vmem:[#allocation2] sm:$0x1] %v12_v0 }
   0x3   :  { %14 = vsyncpa [#allocation4], 0 }
   0x4   :  { %15 = vsyncpa [#allocation6], 0  ;;  %s1801_s26 = smov [#allocation5]   ;;  %s1731_s30 = scalar_lea.hbm %s1952_s1, 4096 }
   0x5   :  { %s33_s27 = sshll.u32 %s1801_s26, 4  ;;  %p1732_p0 = scmp.ne.s32.totalorder %s1952_s1, %s1731_s30  ;;  %s34_s27 = int_to_ptr.vmem [resolvable:$true] %s33_s27 }
   0x6   :  { %p1735_p1 = scmp.lt.u32.totalorder %s1731_s30, %s1952_s1 }
   0x8   :  { %p1737_p2 = pnand %p1735_p1, %p1732_p0 }
   0xa   :  { %1740 = shalt.err (!%p1737_p2)
}
   0xb   :  { %s1741_s6 = scalar_lea.vmem %s34_s27, 4096  ;;  %p1746_p4 = scmp.lt.s32.totalorder %s34_s27, %s34_s27 }
   0xc   :  { %p1742_p3 = scmp.ne.s32.totalorder %s34_s27, %s1741_s6  ;;  %p1747_p5 = scmp.lt.s32.totalorder %s1741_s6, %s1741_s6 }
   0xe   :  { %p1748_p6 = por %p1747_p5, %p1746_p4 }
  0x10   :  { %p1749_p7 = pnand %p1748_p6, %p1742_p3 }
  0x12   :  { %1752 = shalt.err (!%p1749_p7)
}
  0x13   :  { %s1802_s12 = smov 512   ;;  %s1803_s13 = smov 32  }
  0x14   :  { %39 = dma.hbm_to_vmem [thread:$0]  %s1952_s1, 4096, %s34_s27, [#allocation6], %s1802_s12, %s1802_s12, %s1803_s13  }
  0x15   :  { %s1804_s16 = smov [#allocation3]   ;;  %s1753_s20 = scalar_lea.hbm %s1951_s0, 256 }
  0x16   :  { %s21_s17 = sshll.u32 %s1804_s16, 4  ;;  %p1754_p8 = scmp.ne.s32.totalorder %s1951_s0, %s1753_s20  ;;  %s22_s17 = int_to_ptr.vmem [resolvable:$true] %s21_s17 }
  0x17   :  { %p1757_p9 = scmp.lt.u32.totalorder %s1753_s20, %s1951_s0 }
  0x19   :  { %p1759_p10 = pnand %p1757_p9, %p1754_p8 }
  0x1b   :  { %1762 = shalt.err (!%p1759_p10)
}
  0x1c   :  { %s1763_s25 = scalar_lea.vmem %s22_s17, 256  ;;  %p1768_p12 = scmp.lt.s32.totalorder %s22_s17, %s22_s17 }
  0x1d   :  { %p1764_p11 = scmp.ne.s32.totalorder %s22_s17, %s1763_s25  ;;  %p1769_p13 = scmp.lt.s32.totalorder %s1763_s25, %s1763_s25 }
  0x1f   :  { %p1770_p0 = por %p1769_p13, %p1768_p12 }
  0x21   :  { %p1771_p1 = pnand %p1770_p0, %p1764_p11 }
  0x23   :  { %1774 = shalt.err (!%p1771_p1)
}
  0x24   :  { %s1805_s1 = smov 128   ;;  %s1806_s26 = smov 8  }
  0x25   :  { %27 = dma.hbm_to_vmem [thread:$0]  %s1951_s0, 256, %s22_s17, [#allocation4], %s1805_s1, %s1805_s1, %s1806_s26  }
  0x26   :  { %s1807_s29 = smov [#allocation7]   ;;  %s1775_s10 = scalar_lea.hbm %s1954_s3, 16384 }
  0x27   :  { %s47_s30 = sshll.u32 %s1807_s29, 4  ;;  %p1776_p2 = scmp.ne.s32.totalorder %s1954_s3, %s1775_s10  ;;  %s48_s30 = int_to_ptr.vmem [resolvable:$true] %s47_s30 }
  0x28   :  { %p1779_p3 = scmp.lt.u32.totalorder %s1775_s10, %s1954_s3 }
  0x2a   :  { %p1781_p4 = pnand %p1779_p3, %p1776_p2 }
  0x2c   :  { %1784 = shalt.err (!%p1781_p4)
}
  0x2d   :  { %s1785_s14 = scalar_lea.vmem %s48_s30, 16384  ;;  %p1790_p6 = scmp.lt.s32.totalorder %s48_s30, %s48_s30 }
  0x2e   :  { %p1786_p5 = scmp.ne.s32.totalorder %s48_s30, %s1785_s14  ;;  %p1791_p7 = scmp.lt.s32.totalorder %s1785_s14, %s1785_s14 }
  0x30   :  { %p1792_p8 = por %p1791_p7, %p1790_p6 }
  0x32   :  { %p1793_p9 = pnand %p1792_p8, %p1786_p5 }
  0x34   :  { %1796 = shalt.err (!%p1793_p9)
}
  0x35   :  { %s1808_s0 = smov 256   ;;  %s1809_s15 = smov 16  }
  0x36   :  { %53 = dma.hbm_to_vmem [thread:$0]  %s1954_s3, 16384, %s48_s30, [#allocation6], %s1808_s0, %s1808_s0, %s1809_s15  }
  0x37   :  { %1797 = dma.done.wait [#allocation4], 256  }
  0x38   :  { %1798 = vsyncadd [#allocation4], 4294967040 }
  0x39   :  { %1799 = dma.done.wait [#allocation6], 20480  }
  0x3a   :  { %1800 = vsyncadd [#allocation6], 4294946816  ;;  %v1810_v1 = vmov 0.0   ;;  %v72_v2 = vld [vmem:[#allocation5 + $0x8] sm:$0xff]  ;;  %v71_v4 = vld [vmem:[#allocation5] sm:$0xff]  ;;  %vm132_vm0 = vcmask 1043456  }
  0x3b   :  { %209 = vmatprep.mubr.f32.mxu0 %v1810_v1  ;;  %286 = vmatprep.mubr.f32.mxu1 %v1810_v1  ;;  %v76_v3 = vld [vmem:[#allocation5 + $0x28] sm:$0xff]  ;;  %v75_v6 = vld [vmem:[#allocation5 + $0x20] sm:$0xff]  ;;  %v74_v21 = vld [vmem:[#allocation5 + $0x18] sm:$0xff]  ;;  %vm1811_vm1 = vmmov 1   ;;  %vm125_vm3 = vcmask 490496   ;;  %vm1330_vm4 = vcmask 7168  }
  0x3c   :  { %v1476_v5 = vpack.c.bf16 %v76_v3, %v72_v2  ;;  %v80_v7 = vld [vmem:[#allocation5 + $0x48] sm:$0xff]  ;;  %v1478_v9 = vpack.c.bf16 %v75_v6, %v71_v4  ;;  %v79_v11 = vld [vmem:[#allocation5 + $0x40] sm:$0xff]  ;;  %v78_v22 = vld [vmem:[#allocation5 + $0x38] sm:$0xff] }
  0x3d   :  { %v84_v8 = vld [vmem:[#allocation5 + $0x68] sm:$0xff]  ;;  %v83_v12 = vld [vmem:[#allocation5 + $0x60] sm:$0xff]  ;;  %v73_v23 = vld [vmem:[#allocation5 + $0x10] sm:$0xff]  ;;  %v1494_v24 = vpack.c.bf16 %v78_v22, %v74_v21 }
  0x3e   :  { %v1480_v10 = vpack.c.bf16 %v84_v8, %v80_v7  ;;  %v88_v13 = vld [vmem:[#allocation5 + $0x88] sm:$0xff]  ;;  %1477 = vmatprep.subr.bf16.mxu0 %v1476_v5  ;;  %v1482_v15 = vpack.c.bf16 %v83_v12, %v79_v11  ;;  %v87_v16 = vld [vmem:[#allocation5 + $0x80] sm:$0xff]  ;;  %v77_v25 = vld [vmem:[#allocation5 + $0x30] sm:$0xff] }
  0x3f   :  { %v92_v14 = vld [vmem:[#allocation5 + $0xa8] sm:$0xff]  ;;  %1479 = vmatpush1.bf16.msra.mxu0 %v1478_v9  ;;  %v91_v18 = vld [vmem:[#allocation5 + $0xa0] sm:$0xff]  ;;  %v82_v26 = vld [vmem:[#allocation5 + $0x58] sm:$0xff]  ;;  %v1496_v29 = vpack.c.bf16 %v77_v25, %v73_v23  ;;  %1495 = vmatprep.subr.bf16.mxu1 %v1494_v24 }
  0x40   :  { %1481 = vmatprep.subr.bf16.mxu0 %v1480_v10  ;;  %v1484_v17 = vpack.c.bf16 %v92_v14, %v88_v13  ;;  %v96_v19 = vld [vmem:[#allocation5 + $0xc8] sm:$0xff]  ;;  %v86_v27 = vld [vmem:[#allocation5 + $0x78] sm:$0xff]  ;;  %v1486_v28 = vpack.c.bf16 %v91_v18, %v87_v16  ;;  %v81_v31 = vld [vmem:[#allocation5 + $0x50] sm:$0xff] }
  0x41   :  { %v100_v20 = vld [vmem:[#allocation5 + $0xe8] sm:$0xf]  ;;  %v1498_v30 = vpack.c.bf16 %v86_v27, %v82_v26  ;;  %v85_v32 = vld [vmem:[#allocation5 + $0x70] sm:$0xff]  ;;  %v90_v33 = vld [vmem:[#allocation5 + $0x98] sm:$0xff]  ;;  %1497 = vmatpush1.bf16.msra.mxu1 %v1496_v29 }
  0x42   :  { %v1488_v34 = vpack.c.bf16 %v100_v20, %v96_v19  ;;  %v95_v35 = vld [vmem:[#allocation5 + $0xc0] sm:$0xff]  ;;  %v94_v37 = vld [vmem:[#allocation5 + $0xb8] sm:$0xff]  ;;  %vm1894_vm2 = vmpackc.low %vm132_vm0, %vm1811_vm1  ;;  %v1500_v39 = vpack.c.bf16 %v85_v32, %v81_v31 }
  0x43   :  { %1483 = vmatpush1.bf16.msra.mxu0 %v1482_v15  ;;  %v99_v36 = vld [vmem:[#allocation5 + $0xe0] sm:$0xf]  ;;  %v89_v40 = vld [vmem:[#allocation5 + $0x90] sm:$0xff]  ;;  %1499 = vmatprep.subr.bf16.mxu1 %v1498_v30  ;;  %v1502_v41 = vpack.c.bf16 %v94_v37, %v90_v33  ;;  %v98_v44 = vld [vmem:[#allocation5 + $0xd8] sm:$0xff] }
  0x44   :  { %1485 = vmatprep.subr.bf16.mxu0 %v1484_v17  ;;  %v93_v42 = vld [vmem:[#allocation5 + $0xb0] sm:$0xff]  ;;  %v1491_v43 = vpack.c.bf16 %v99_v36, %v95_v35  ;;  %v102_v45 = vld [vmem:[#allocation5 + $0xf8] sm:$0xf]  ;;  %v1544_v55 = vld [vmem:[#allocation7 + $0xc] ss:$16 sps:$4 sm:$0xff]  }
  0x45   :  { %v1541_v46 = vld [vmem:[#allocation7 + $0x4] ss:$16 sps:$4 sm:$0xff]   ;;  %1501 = vmatpush1.bf16.msra.mxu1 %v1500_v39  ;;  %v1504_v47 = vpack.c.bf16 %v93_v42, %v89_v40  ;;  %v1506_v49 = vpack.c.bf16 %v102_v45, %v98_v44  ;;  %v101_v50 = vld [vmem:[#allocation5 + $0xf0] sm:$0xf]  ;;  %v70_v56 = vld [vmem:[#allocation3 + $0x8] sm:$0xff] }
  0x46   :  { %v97_v48 = vld [vmem:[#allocation5 + $0xd0] sm:$0xff]  ;;  %1503 = vmatprep.subr.bf16.mxu1 %v1502_v41  ;;  %v1542_v59 = vld [vmem:[#allocation7 + $0x8] ss:$16 sps:$4 sm:$0xff]   ;;  %v1550_v60 = vld [vmem:[#allocation7 + $0x2c] ss:$16 sps:$4 sm:$0xff]  }
  0x47   :  { %1487 = vmatpush1.bf16.msra.mxu0 %v1486_v28  ;;  %v69_v51 = vld [vmem:[#allocation3] sm:$0xff]  ;;  %v1509_v54 = vpack.c.bf16 %v101_v50, %v97_v48  ;;  %v1548_v63 = vld [vmem:[#allocation7 + $0x28] ss:$16 sps:$4 sm:$0xff]   ;;  %v1556_v0 = vld [vmem:[#allocation7 + $0x4c] ss:$16 sps:$4 sm:$0xff]  }
  0x48   :  { %1490 = vmatprep.subr.msk.bf16.mxu0 %vm1894_vm2, %v1488_v34  ;;  %v1539_v52 = vld [vmem:[#allocation7] ss:$16 sps:$4 sm:$0xff]   ;;  %v1547_v53 = vld [vmem:[#allocation7 + $0x24] ss:$16 sps:$4 sm:$0xff]   ;;  %v1554_v4 = vld [vmem:[#allocation7 + $0x48] ss:$16 sps:$4 sm:$0xff]  }
  0x49   :  { %1505 = vmatpush1.bf16.msra.mxu1 %v1504_v47  ;;  %v1545_v57 = vld [vmem:[#allocation7 + $0x20] ss:$16 sps:$4 sm:$0xff]   ;;  %v1553_v58 = vld [vmem:[#allocation7 + $0x44] ss:$16 sps:$4 sm:$0xff]   ;;  %v1562_v5 = vld [vmem:[#allocation7 + $0x6c] ss:$16 sps:$4 sm:$0xff]  }
  0x4a   :  { %1508 = vmatprep.subr.msk.bf16.mxu1 %vm1894_vm2, %v1506_v49  ;;  %v1551_v61 = vld [vmem:[#allocation7 + $0x40] ss:$16 sps:$4 sm:$0xff]   ;;  %v1559_v62 = vld [vmem:[#allocation7 + $0x64] ss:$16 sps:$4 sm:$0xff]   ;;  %v1568_v8 = vld [vmem:[#allocation7 + $0x8c] ss:$16 sps:$4 sm:$0xff]  }
  0x4b   :  { %1493 = vmatpush1.bf16.msk.msra.mxu0 %vm1894_vm2, %v1491_v43  ;;  %v1557_v2 = vld [vmem:[#allocation7 + $0x60] ss:$16 sps:$4 sm:$0xff]   ;;  %v1565_v3 = vld [vmem:[#allocation7 + $0x84] ss:$16 sps:$4 sm:$0xff]   ;;  %v1566_v11 = vld [vmem:[#allocation7 + $0x88] ss:$16 sps:$4 sm:$0xff]  }
  0x4c   :  { %1101 = vmatprep.subr.bf16.mxu0 %v1541_v46  ;;  %v1563_v6 = vld [vmem:[#allocation7 + $0x80] ss:$16 sps:$4 sm:$0xff]   ;;  %v1571_v7 = vld [vmem:[#allocation7 + $0xa4] ss:$16 sps:$4 sm:$0xff]   ;;  %v1574_v12 = vld [vmem:[#allocation7 + $0xac] ss:$16 sps:$4 sm:$0xff]  }
  0x4d   :  { %1511 = vmatpush1.bf16.msk.msra.mxu1 %vm1894_vm2, %v1509_v54  ;;  %v1569_v9 = vld [vmem:[#allocation7 + $0xa0] ss:$16 sps:$4 sm:$0xff]   ;;  %v1577_v10 = vld [vmem:[#allocation7 + $0xc4] ss:$16 sps:$4 sm:$0xff]   ;;  %v1572_v15 = vld [vmem:[#allocation7 + $0xa8] ss:$16 sps:$4 sm:$0xff]  }
  0x4e   :  { %1341 = vmatmul.mubr.msk.f32.vlgmr.msra.gmra.mrb[0].mxu0 %vm125_vm3, %v69_v51  ;;  %1187 = vmatprep.subr.bf16.mxu1 %v1544_v55  ;;  %v1575_v13 = vld [vmem:[#allocation7 + $0xc0] ss:$16 sps:$4 sm:$0xff]   ;;  %v1583_v14 = vld [vmem:[#allocation7 + $0xe4] ss:$16 sps:$4 sm:$0xff]   ;;  %v1580_v16 = vld [vmem:[#allocation7 + $0xcc] ss:$16 sps:$4 sm:$0xff]   ;;  %v105_v55 = vlaneseq }
  0x4f   :  { %215 = vmatprep.mubr.f32.mxu0 %v1810_v1  ;;  %1102 = vmatpush1.bf16.msra.mxu0 %v1539_v52  ;;  %v1578_v17 = vld [vmem:[#allocation7 + $0xc8] ss:$16 sps:$4 sm:$0xff]   ;;  %v1581_v18 = vld [vmem:[#allocation7 + $0xe0] ss:$16 sps:$4 sm:$0xff]   ;;  %v1586_v19 = vld [vmem:[#allocation7 + $0xec] ss:$16 sps:$4 sm:$0xff]  }
  0x50   :  { %1103 = vmatprep.subr.bf16.mxu0 %v1547_v53  ;;  %1345 = vmatmul.mubr.msk.f32.vlgmr.msra.gmra.mrb[0].mxu1 %vm125_vm3, %v69_v51  ;;  %v1589_v20 = vld [vmem:[#allocation7 + $0x104] ss:$16 sps:$4 sm:$0xff]   ;;  %v1587_v21 = vld [vmem:[#allocation7 + $0x100] ss:$16 sps:$4 sm:$0xff]   ;;  %v1584_v23 = vld [vmem:[#allocation7 + $0xe8] ss:$16 sps:$4 sm:$0xff]  }
  0x51   :  { %292 = vmatprep.mubr.f32.mxu1 %v1810_v1  ;;  %1188 = vmatpush1.bf16.msra.mxu1 %v1542_v59  ;;  %v1560_v1 = vld [vmem:[#allocation7 + $0x68] ss:$16 sps:$4 sm:$0xff]   ;;  %v1595_v22 = vld [vmem:[#allocation7 + $0x124] ss:$16 sps:$4 sm:$0xff]   ;;  %v1592_v24 = vld [vmem:[#allocation7 + $0x10c] ss:$16 sps:$4 sm:$0xff]  }
  0x52   :  { %1342 = vmatmul.mubr.msk.f32.gmra.mrb[2].mxu0 %vm125_vm3, %v70_v56  ;;  %1189 = vmatprep.subr.bf16.mxu1 %v1550_v60  ;;  %v1593_v25 = vld [vmem:[#allocation7 + $0x120] ss:$16 sps:$4 sm:$0xff]   ;;  %v1601_v26 = vld [vmem:[#allocation7 + $0x144] ss:$16 sps:$4 sm:$0xff]   ;;  %v1590_v27 = vld [vmem:[#allocation7 + $0x108] ss:$16 sps:$4 sm:$0xff]  }
  0x53   :  { %1104 = vmatpush1.bf16.msra.mxu0 %v1545_v57  ;;  %v1598_v28 = vld [vmem:[#allocation7 + $0x12c] ss:$16 sps:$4 sm:$0xff]   ;;  %v1599_v29 = vld [vmem:[#allocation7 + $0x140] ss:$16 sps:$4 sm:$0xff]   ;;  %v1607_v30 = vld [vmem:[#allocation7 + $0x164] ss:$16 sps:$4 sm:$0xff]  }
  0x54   :  { %1105 = vmatprep.subr.bf16.mxu0 %v1553_v58  ;;  %1346 = vmatmul.mubr.msk.f32.gmra.mrb[2].mxu1 %vm125_vm3, %v70_v56  ;;  %v1596_v31 = vld [vmem:[#allocation7 + $0x128] ss:$16 sps:$4 sm:$0xff]   ;;  %v1604_v32 = vld [vmem:[#allocation7 + $0x14c] ss:$16 sps:$4 sm:$0xff]   ;;  %v1605_v33 = vld [vmem:[#allocation7 + $0x160] ss:$16 sps:$4 sm:$0xff]  }
  0x55   :  { %1190 = vmatpush1.bf16.msra.mxu1 %v1548_v63  ;;  %v1613_v34 = vld [vmem:[#allocation7 + $0x184] ss:$16 sps:$4 sm:$0xff]   ;;  %v1602_v35 = vld [vmem:[#allocation7 + $0x148] ss:$16 sps:$4 sm:$0xff]   ;;  %v1610_v36 = vld [vmem:[#allocation7 + $0x16c] ss:$16 sps:$4 sm:$0xff]  }
  0x56   :  { %1191 = vmatprep.subr.bf16.mxu1 %v1556_v0  ;;  %v1611_v37 = vld [vmem:[#allocation7 + $0x180] ss:$16 sps:$4 sm:$0xff]   ;;  %v1608_v38 = vld [vmem:[#allocation7 + $0x168] ss:$16 sps:$4 sm:$0xff]   ;;  %v1616_v39 = vld [vmem:[#allocation7 + $0x18c] ss:$16 sps:$4 sm:$0xff]  }
  0x57   :  { %1106 = vmatpush1.bf16.msra.mxu0 %v1551_v61  ;;  %v1614_v40 = vld [vmem:[#allocation7 + $0x188] ss:$16 sps:$4 sm:$0xff]   ;;  %v1619_v41 = vld [vmem:[#allocation7 + $0x1a4] ss:$16 sps:$4 sm:$0xff]   ;;  %v1622_v42 = vld [vmem:[#allocation7 + $0x1ac] ss:$16 sps:$4 sm:$0xff]  }
  0x58   :  { %1107 = vmatprep.subr.bf16.mxu0 %v1559_v62  ;;  %v1617_v43 = vld [vmem:[#allocation7 + $0x1a0] ss:$16 sps:$4 sm:$0xff]   ;;  %v1620_v44 = vld [vmem:[#allocation7 + $0x1a8] ss:$16 sps:$4 sm:$0xff]   ;;  %v1625_v45 = vld [vmem:[#allocation7 + $0x1c4] ss:$16 sps:$4 sm:$0xff]  }
  0x59   :  { %1192 = vmatpush1.bf16.msra.mxu1 %v1554_v4  ;;  %v1628_v46 = vld [vmem:[#allocation7 + $0x1cc] ss:$16 sps:$4 sm:$0xff]   ;;  %v1623_v47 = vld [vmem:[#allocation7 + $0x1c0] ss:$16 sps:$4 sm:$0xff]   ;;  %v1626_v48 = vld [vmem:[#allocation7 + $0x1c8] ss:$16 sps:$4 sm:$0xff]  }
  0x5a   :  { %1193 = vmatprep.subr.bf16.mxu1 %v1562_v5  ;;  %v1631_v49 = vld [vmem:[#allocation7 + $0x1e4] ss:$16 sps:$4 sm:$0xff]   ;;  %v1634_v50 = vld [vmem:[#allocation7 + $0x1ec] ss:$16 sps:$4 sm:$0xff]   ;;  %v1629_v51 = vld [vmem:[#allocation7 + $0x1e0] ss:$16 sps:$4 sm:$0xff]  }
  0x5b   :  { %1108 = vmatpush1.bf16.msra.mxu0 %v1557_v2  ;;  %v1632_v52 = vld [vmem:[#allocation7 + $0x1e8] ss:$16 sps:$4 sm:$0xff]   ;;  %v1637_v53 = vld [vmem:[#allocation7 + $0x204] ss:$16 sps:$4 sm:$0xff]   ;;  %v1640_v54 = vld [vmem:[#allocation7 + $0x20c] ss:$16 sps:$4 sm:$0xff]  }
  0x5c   :  { %1109 = vmatprep.subr.bf16.mxu0 %v1565_v3  ;;  %v106_v56 = vshrl.u32 %v105_v55, 7  ;;  %v103_v58 = vld [vmem:[%s1953_s2] sm:$0xf]  ;;  %v1674_v55 = vld [vmem:[#allocation7 + $0x2c8] ss:$16 sps:$4 sm:$0xff]  }
  0x5d   :  { %1194 = vmatpush1.bf16.msra.mxu1 %v1560_v1 }
  0x5e   :  { %1195 = vmatprep.subr.bf16.mxu1 %v1568_v8  ;;  %v1912_v57 = vsub.s32 0, %v106_v56  ;;  %v1917_v59 = vsub.s32 1, %v106_v56  ;;  %v1920_v61 = vsub.s32 2, %v106_v56  ;;  %v1923_v0 = vsub.s32 3, %v106_v56  ;;  %v1679_v56 = vld [vmem:[#allocation7 + $0x2e4] ss:$16 sps:$4 sm:$0xff]  }
  0x5f   :  { %1110 = vmatpush1.bf16.msra.mxu0 %v1563_v6 }
  0x60   :  { %1111 = vmatprep.subr.bf16.mxu0 %v1571_v7  ;;  %v108_v60 = vrot.slane %v103_v58, %v1912_v57  ;;  %v112_v63 = vrot.slane %v103_v58, %v1917_v59  ;;  %v116_v4 = vrot.slane %v103_v58, %v1920_v61  ;;  %v120_v7 = vrot.slane %v103_v58, %v1923_v0  ;;  %v1682_v58 = vld [vmem:[#allocation7 + $0x2ec] ss:$16 sps:$4 sm:$0xff]  }
  0x61   :  { %1196 = vmatpush1.bf16.msra.mxu1 %v1566_v11 }
  0x62   :  { %1197 = vmatprep.subr.bf16.mxu1 %v1574_v12 }
  0x63   :  { %1112 = vmatpush1.bf16.msra.mxu0 %v1569_v9 }
  0x64   :  { %1113 = vmatprep.subr.bf16.mxu0 %v1577_v10 }
  0x65   :  { %1198 = vmatpush1.bf16.msra.mxu1 %v1572_v15 }
  0x66   :  { %1199 = vmatprep.subr.bf16.mxu1 %v1580_v16 }
  0x67   :  { %1114 = vmatpush1.bf16.msra.mxu0 %v1575_v13 }
  0x68   :  { %1115 = vmatprep.subr.bf16.mxu0 %v1583_v14 }
  0x69   :  { %1200 = vmatpush1.bf16.msra.mxu1 %v1578_v17 }
  0x6a   :  { %1201 = vmatprep.subr.bf16.mxu1 %v1586_v19 }
  0x6b   :  { %1116 = vmatpush1.bf16.msra.mxu0 %v1581_v18 }
  0x6c   :  { %1117 = vmatprep.subr.bf16.mxu0 %v1589_v20  ;;  %v1635_v20 = vld [vmem:[#allocation7 + $0x200] ss:$16 sps:$4 sm:$0xff]  }
  0x6d   :  { %1202 = vmatpush1.bf16.msra.mxu1 %v1584_v23  ;;  %v1643_v23 = vld [vmem:[#allocation7 + $0x224] ss:$16 sps:$4 sm:$0xff]  }
  0x6e   :  { %1203 = vmatprep.subr.bf16.mxu1 %v1592_v24  ;;  %v1646_v24 = vld [vmem:[#allocation7 + $0x22c] ss:$16 sps:$4 sm:$0xff]  }
  0x6f   :  { %1118 = vmatpush1.bf16.msra.mxu0 %v1587_v21  ;;  %v1638_v21 = vld [vmem:[#allocation7 + $0x208] ss:$16 sps:$4 sm:$0xff]  }
  0x70   :  { %1119 = vmatprep.subr.bf16.mxu0 %v1595_v22 }
  0x71   :  { %1204 = vmatpush1.bf16.msra.mxu1 %v1590_v27 }
  0x72   :  { %1205 = vmatprep.subr.bf16.mxu1 %v1598_v28 }
  0x73   :  { %1120 = vmatpush1.bf16.msra.mxu0 %v1593_v25 }
  0x74   :  { %1121 = vmatprep.subr.bf16.mxu0 %v1601_v26 }
  0x75   :  { %1206 = vmatpush1.bf16.msra.mxu1 %v1596_v31  ;;  %v1641_v31 = vld [vmem:[#allocation7 + $0x220] ss:$16 sps:$4 sm:$0xff]  }
  0x76   :  { %1207 = vmatprep.subr.bf16.mxu1 %v1604_v32  ;;  %v1644_v32 = vld [vmem:[#allocation7 + $0x228] ss:$16 sps:$4 sm:$0xff]  }
  0x77   :  { %1122 = vmatpush1.bf16.msra.mxu0 %v1599_v29 }
  0x78   :  { %1123 = vmatprep.subr.bf16.mxu0 %v1607_v30 }
  0x79   :  { %1208 = vmatpush1.bf16.msra.mxu1 %v1602_v35  ;;  %v1652_v35 = vld [vmem:[#allocation7 + $0x24c] ss:$16 sps:$4 sm:$0xff]  }
  0x7a   :  { %1209 = vmatprep.subr.bf16.mxu1 %v1610_v36 }
  0x7b   :  { %1124 = vmatpush1.bf16.msra.mxu0 %v1605_v33 }
  0x7c   :  { %1125 = vmatprep.subr.bf16.mxu0 %v1613_v34  ;;  %v1649_v34 = vld [vmem:[#allocation7 + $0x244] ss:$16 sps:$4 sm:$0xff]  }
  0x7d   :  { %1210 = vmatpush1.bf16.msra.mxu1 %v1608_v38  ;;  %v1647_v38 = vld [vmem:[#allocation7 + $0x240] ss:$16 sps:$4 sm:$0xff]  }
  0x7e   :  { %1211 = vmatprep.subr.bf16.mxu1 %v1616_v39  ;;  %v1650_v39 = vld [vmem:[#allocation7 + $0x248] ss:$16 sps:$4 sm:$0xff]  }
  0x7f   :  { %1126 = vmatpush1.bf16.msra.mxu0 %v1611_v37 }
  0x80   :  { %1127 = vmatprep.subr.bf16.mxu0 %v1619_v41  ;;  %v1658_v41 = vld [vmem:[#allocation7 + $0x26c] ss:$16 sps:$4 sm:$0xff]  }
  0x81   :  { %1212 = vmatpush1.bf16.msra.mxu1 %v1614_v40  ;;  %v1655_v40 = vld [vmem:[#allocation7 + $0x264] ss:$16 sps:$4 sm:$0xff]  }
  0x82   :  { %1213 = vmatprep.subr.bf16.mxu1 %v1622_v42  ;;  %v1653_v42 = vld [vmem:[#allocation7 + $0x260] ss:$16 sps:$4 sm:$0xff]  }
  0x83   :  { %1128 = vmatpush1.bf16.msra.mxu0 %v1617_v43  ;;  %v1656_v43 = vld [vmem:[#allocation7 + $0x268] ss:$16 sps:$4 sm:$0xff]  }
  0x84   :  { %1129 = vmatprep.subr.bf16.mxu0 %v1625_v45  ;;  %v1664_v45 = vld [vmem:[#allocation7 + $0x28c] ss:$16 sps:$4 sm:$0xff]  }
  0x85   :  { %1214 = vmatpush1.bf16.msra.mxu1 %v1620_v44  ;;  %v1661_v44 = vld [vmem:[#allocation7 + $0x284] ss:$16 sps:$4 sm:$0xff]  }
  0x86   :  { %1215 = vmatprep.subr.bf16.mxu1 %v1628_v46  ;;  %v1659_v46 = vld [vmem:[#allocation7 + $0x280] ss:$16 sps:$4 sm:$0xff]  }
  0x87   :  { %1130 = vmatpush1.bf16.msra.mxu0 %v1623_v47  ;;  %v1662_v47 = vld [vmem:[#allocation7 + $0x288] ss:$16 sps:$4 sm:$0xff]  }
  0x88   :  { %1131 = vmatprep.subr.bf16.mxu0 %v1631_v49  ;;  %v1670_v49 = vld [vmem:[#allocation7 + $0x2ac] ss:$16 sps:$4 sm:$0xff]  }
  0x89   :  { %1216 = vmatpush1.bf16.msra.mxu1 %v1626_v48  ;;  %v1667_v48 = vld [vmem:[#allocation7 + $0x2a4] ss:$16 sps:$4 sm:$0xff]  }
  0x8a   :  { %1217 = vmatprep.subr.bf16.mxu1 %v1634_v50  ;;  %v1665_v50 = vld [vmem:[#allocation7 + $0x2a0] ss:$16 sps:$4 sm:$0xff]  }
  0x8b   :  { %1132 = vmatpush1.bf16.msra.mxu0 %v1629_v51  ;;  %v1668_v51 = vld [vmem:[#allocation7 + $0x2a8] ss:$16 sps:$4 sm:$0xff]  }
  0x8c   :  { %1144 = vmatprep.subr.bf16.mxu0 %v1637_v53  ;;  %v1676_v53 = vld [vmem:[#allocation7 + $0x2cc] ss:$16 sps:$4 sm:$0xff]  }
  0x8d   :  { %1218 = vmatpush1.bf16.msra.mxu1 %v1632_v52  ;;  %v1673_v52 = vld [vmem:[#allocation7 + $0x2c4] ss:$16 sps:$4 sm:$0xff]  }
  0x8e   :  { %1230 = vmatprep.subr.bf16.mxu1 %v1640_v54  ;;  %v1671_v54 = vld [vmem:[#allocation7 + $0x2c0] ss:$16 sps:$4 sm:$0xff]  }
 0x121   :  { %v211_v62 = vpop.f32.mrb[0].mxu0 }
 0x122   :  { %v213_v2 = vpop.f32.mrb[1].mxu0  ;;  %v212_v3 = vadd.f32 %v211_v62, %v108_v60  ;;  %v1680_v62 = vld [vmem:[#allocation7 + $0x2e8] ss:$16 sps:$4 sm:$0xff]  }
 0x123   :  { %v214_v5 = vadd.f32 %v213_v2, %v112_v63  ;;  %v288_v10 = vpop.f32.mrb[0].mxu1  ;;  %v1688_v2 = vld [vmem:[#allocation7 + $0x30c] ss:$16 sps:$4 sm:$0xff]  }
 0x124   :  { %v299_v11 = vmax.f32 %v212_v3, 0.0  ;;  %v289_v13 = vadd.f32 %v288_v10, %v116_v4  ;;  %v290_v14 = vpop.f32.mrb[1].mxu1  ;;  %v1683_v3 = vld [vmem:[#allocation7 + $0x300] ss:$16 sps:$4 sm:$0xff]  }
 0x125   :  { %v217_v6 = vpop.f32.mrb[2].mxu0  ;;  %v300_v15 = vmax.f32 %v214_v5, 0.0  ;;  %v291_v17 = vadd.f32 %v290_v14, %v120_v7  ;;  %v1691_v5 = vld [vmem:[#allocation7 + $0x324] ss:$16 sps:$4 sm:$0xff]   ;;  %v1695_v10 = vld [vmem:[#allocation7 + $0x340] ss:$16 sps:$4 sm:$0xff]  }
 0x126   :  { %v218_v1 = vadd.f32 %v217_v6, %v108_v60  ;;  %v219_v8 = vpop.f32.mrb[3].mxu0  ;;  %v301_v25 = vmax.f32 %v289_v13, 0.0  ;;  %v1677_v60 = vld [vmem:[#allocation7 + $0x2e0] ss:$16 sps:$4 sm:$0xff]   ;;  %v1694_v6 = vld [vmem:[#allocation7 + $0x32c] ss:$16 sps:$4 sm:$0xff]  }
 0x127   :  { %v220_v9 = vadd.f32 %v219_v8, %v112_v63  ;;  %v294_v22 = vpop.f32.mrb[2].mxu1  ;;  %v302_v28 = vmax.f32 %v291_v17, 0.0  ;;  %v1685_v63 = vld [vmem:[#allocation7 + $0x304] ss:$16 sps:$4 sm:$0xff]   ;;  %v1706_v13 = vld [vmem:[#allocation7 + $0x36c] ss:$16 sps:$4 sm:$0xff]  }
 0x128   :  { %v303_v12 = vmax.f32 %v218_v1, 0.0  ;;  %v295_v26 = vadd.f32 %v294_v22, %v116_v4  ;;  %v296_v27 = vpop.f32.mrb[3].mxu1  ;;  %v1686_v4 = vld [vmem:[#allocation7 + $0x308] ss:$16 sps:$4 sm:$0xff]   ;;  %v1697_v8 = vld [vmem:[#allocation7 + $0x344] ss:$16 sps:$4 sm:$0xff]  }
 0x129   :  { %v304_v16 = vmax.f32 %v220_v9, 0.0  ;;  %v297_v29 = vadd.f32 %v296_v27, %v120_v7  ;;  %v1689_v7 = vld [vmem:[#allocation7 + $0x320] ss:$16 sps:$4 sm:$0xff]   ;;  %v1692_v1 = vld [vmem:[#allocation7 + $0x328] ss:$16 sps:$4 sm:$0xff]  }
 0x12a   :  { %v307_v18 = vpack.c.bf16 %v303_v12, %v299_v11  ;;  %v305_v30 = vmax.f32 %v295_v26, 0.0  ;;  %v1700_v9 = vld [vmem:[#allocation7 + $0x34c] ss:$16 sps:$4 sm:$0xff]   ;;  %v1698_v11 = vld [vmem:[#allocation7 + $0x348] ss:$16 sps:$4 sm:$0xff]  }
 0x12b   :  { %v308_v19 = vpack.c.bf16 %v304_v16, %v300_v15  ;;  %v306_v33 = vmax.f32 %v297_v29, 0.0  ;;  %v1703_v12 = vld [vmem:[#allocation7 + $0x364] ss:$16 sps:$4 sm:$0xff]   ;;  %v1701_v14 = vld [vmem:[#allocation7 + $0x360] ss:$16 sps:$4 sm:$0xff]  }
 0x12c   :  { %v1927_v36 = vpack.c.bf16 %v305_v30, %v301_v25  ;;  %v1704_v15 = vld [vmem:[#allocation7 + $0x368] ss:$16 sps:$4 sm:$0xff]   ;;  %v1709_v16 = vld [vmem:[#allocation7 + $0x384] ss:$16 sps:$4 sm:$0xff]   ;;  %v1712_v17 = vld [vmem:[#allocation7 + $0x38c] ss:$16 sps:$4 sm:$0xff]  }
 0x12d   :  { %1133 = vmatprep.mubr.bf16.mxu0 %v308_v19  ;;  %1219 = vmatprep.mubr.bf16.mxu1 %v308_v19  ;;  %v310_v37 = vpack.c.bf16 %v306_v33, %v302_v28  ;;  %v1710_v19 = vld [vmem:[#allocation7 + $0x388] ss:$16 sps:$4 sm:$0xff]   ;;  %v1713_v22 = vld [vmem:[#allocation7 + $0x3a0] ss:$16 sps:$4 sm:$0xff]   ;;  %v1724_v25 = vld [vmem:[#allocation7 + $0x3cc] ss:$16 sps:$4 sm:$0xff]  }
 0x12e   :  { %1134 = vmatmul.mubr.bf16.vlgmr.msra.gmra.mrb[4].mxu0 %v307_v18  ;;  %1220 = vmatmul.mubr.bf16.vlgmr.msra.gmra.mrb[4].mxu1 %v307_v18  ;;  %v1707_v18 = vld [vmem:[#allocation7 + $0x380] ss:$16 sps:$4 sm:$0xff]   ;;  %v1722_v27 = vld [vmem:[#allocation7 + $0x3c8] ss:$16 sps:$4 sm:$0xff]   ;;  %v1727_v28 = vld [vmem:[#allocation7 + $0x3e4] ss:$16 sps:$4 sm:$0xff]  }
 0x12f   :  { %1145 = vmatpush1.bf16.msra.mxu0 %v1635_v20  ;;  %1231 = vmatpush1.bf16.msra.mxu1 %v1638_v21  ;;  %v1715_v20 = vld [vmem:[#allocation7 + $0x3a4] ss:$16 sps:$4 sm:$0xff]   ;;  %v1718_v21 = vld [vmem:[#allocation7 + $0x3ac] ss:$16 sps:$4 sm:$0xff]   ;;  %v1719_v26 = vld [vmem:[#allocation7 + $0x3c0] ss:$16 sps:$4 sm:$0xff]  }
 0x130   :  { %1146 = vmatprep.subr.bf16.mxu0 %v1643_v23  ;;  %1232 = vmatprep.subr.bf16.mxu1 %v1646_v24  ;;  %v1716_v23 = vld [vmem:[#allocation7 + $0x3a8] ss:$16 sps:$4 sm:$0xff]   ;;  %v1721_v24 = vld [vmem:[#allocation7 + $0x3c4] ss:$16 sps:$4 sm:$0xff]   ;;  %v1730_v29 = vld [vmem:[#allocation7 + $0x3ec] ss:$16 sps:$4 sm:$0xff]  }
 0x131   :  { %1176 = vmatprep.mubr.bf16.mxu0 %v310_v37  ;;  %1262 = vmatprep.mubr.bf16.mxu1 %v310_v37  ;;  %v1725_v30 = vld [vmem:[#allocation7 + $0x3e0] ss:$16 sps:$4 sm:$0xff]  }
 0x133   :  { %1147 = vmatpush1.bf16.msra.mxu0 %v1641_v31  ;;  %1233 = vmatpush1.bf16.msra.mxu1 %v1644_v32  ;;  %v1728_v31 = vld [vmem:[#allocation7 + $0x3e8] ss:$16 sps:$4 sm:$0xff]   ;;  %v439_v32 = vld [vmem:[%s1955_s4] sm:$0xf] }
 0x134   :  { %1148 = vmatprep.subr.bf16.mxu0 %v1649_v34  ;;  %1234 = vmatprep.subr.bf16.mxu1 %v1652_v35  ;;  %v444_v33 = vrot.slane %v439_v32, %v1912_v57  ;;  %v452_v34 = vrot.slane %v439_v32, %v1920_v61  ;;  %v1281_v35 = vld [vmem:[%s1956_s5] sm:$0xf]  ;;  %v448_v37 = vrot.slane %v439_v32, %v1917_v59 }
 0x137   :  { %1149 = vmatpush1.bf16.msra.mxu0 %v1647_v38  ;;  %1235 = vmatpush1.bf16.msra.mxu1 %v1650_v39  ;;  %v456_v38 = vrot.slane %v439_v32, %v1923_v0 }
 0x138   :  { %1150 = vmatprep.subr.bf16.mxu0 %v1655_v40  ;;  %1236 = vmatprep.subr.bf16.mxu1 %v1658_v41 }
 0x13b   :  { %1151 = vmatpush1.bf16.msra.mxu0 %v1653_v42  ;;  %1237 = vmatpush1.bf16.msra.mxu1 %v1656_v43 }
 0x13c   :  { %1152 = vmatprep.subr.bf16.mxu0 %v1661_v44  ;;  %1238 = vmatprep.subr.bf16.mxu1 %v1664_v45 }
 0x13f   :  { %1153 = vmatpush1.bf16.msra.mxu0 %v1659_v46  ;;  %1239 = vmatpush1.bf16.msra.mxu1 %v1662_v47  ;;  %v1290_v46 = vrot.slane %v1281_v35, %v1917_v59 }
 0x140   :  { %1154 = vmatprep.subr.bf16.mxu0 %v1667_v48  ;;  %1240 = vmatprep.subr.bf16.mxu1 %v1670_v49 }
 0x143   :  { %1155 = vmatpush1.bf16.msra.mxu0 %v1665_v50  ;;  %1241 = vmatpush1.bf16.msra.mxu1 %v1668_v51  ;;  %v1294_v51 = vrot.slane %v1281_v35, %v1920_v61 }
 0x144   :  { %1156 = vmatprep.subr.bf16.mxu0 %v1673_v52  ;;  %1242 = vmatprep.subr.bf16.mxu1 %v1676_v53 }
 0x147   :  { %1157 = vmatpush1.bf16.msra.mxu0 %v1671_v54  ;;  %1243 = vmatpush1.bf16.msra.mxu1 %v1674_v55 }
 0x148   :  { %1158 = vmatprep.subr.bf16.mxu0 %v1679_v56  ;;  %1244 = vmatprep.subr.bf16.mxu1 %v1682_v58 }
 0x14b   :  { %1159 = vmatpush1.bf16.msra.mxu0 %v1677_v60  ;;  %1245 = vmatpush1.bf16.msra.mxu1 %v1680_v62 }
 0x14c   :  { %1160 = vmatprep.subr.bf16.mxu0 %v1685_v63  ;;  %1246 = vmatprep.subr.bf16.mxu1 %v1688_v2  ;;  %v1298_v2 = vrot.slane %v1281_v35, %v1923_v0  ;;  %v1475_v0 = vld [vmem:[#allocation2] ss:$0 sm:$0xff] }
 0x14f   :  { %1161 = vmatpush1.bf16.msra.mxu0 %v1683_v3  ;;  %1247 = vmatpush1.bf16.msra.mxu1 %v1686_v4 }
 0x150   :  { %1162 = vmatprep.subr.bf16.mxu0 %v1691_v5  ;;  %1248 = vmatprep.subr.bf16.mxu1 %v1694_v6 }
 0x153   :  { %1163 = vmatpush1.bf16.msra.mxu0 %v1689_v7  ;;  %1249 = vmatpush1.bf16.msra.mxu1 %v1692_v1 }
 0x154   :  { %1164 = vmatprep.subr.bf16.mxu0 %v1697_v8  ;;  %1250 = vmatprep.subr.bf16.mxu1 %v1700_v9 }
 0x157   :  { %1165 = vmatpush1.bf16.msra.mxu0 %v1695_v10  ;;  %1251 = vmatpush1.bf16.msra.mxu1 %v1698_v11 }
 0x158   :  { %1166 = vmatprep.subr.bf16.mxu0 %v1703_v12  ;;  %1252 = vmatprep.subr.bf16.mxu1 %v1706_v13 }
 0x15b   :  { %1167 = vmatpush1.bf16.msra.mxu0 %v1701_v14  ;;  %1253 = vmatpush1.bf16.msra.mxu1 %v1704_v15 }
 0x15c   :  { %1168 = vmatprep.subr.bf16.mxu0 %v1709_v16  ;;  %1254 = vmatprep.subr.bf16.mxu1 %v1712_v17 }
 0x15f   :  { %1169 = vmatpush1.bf16.msra.mxu0 %v1707_v18  ;;  %1255 = vmatpush1.bf16.msra.mxu1 %v1710_v19 }
 0x160   :  { %1170 = vmatprep.subr.bf16.mxu0 %v1715_v20  ;;  %1256 = vmatprep.subr.bf16.mxu1 %v1718_v21 }
 0x163   :  { %1171 = vmatpush1.bf16.msra.mxu0 %v1713_v22  ;;  %1257 = vmatpush1.bf16.msra.mxu1 %v1716_v23 }
 0x164   :  { %1172 = vmatprep.subr.bf16.mxu0 %v1721_v24  ;;  %1258 = vmatprep.subr.bf16.mxu1 %v1724_v25 }
 0x167   :  { %1173 = vmatpush1.bf16.msra.mxu0 %v1719_v26  ;;  %1259 = vmatpush1.bf16.msra.mxu1 %v1722_v27 }
 0x168   :  { %1174 = vmatprep.subr.bf16.mxu0 %v1727_v28  ;;  %1260 = vmatprep.subr.bf16.mxu1 %v1730_v29 }
 0x16b   :  { %1175 = vmatpush1.bf16.msra.mxu0 %v1725_v30  ;;  %1261 = vmatpush1.bf16.msra.mxu1 %v1728_v31 }
 0x16e   :  { %1177 = vmatmul.mubr.bf16.vlgmr.msra.gmra.mrb[4].mxu0 %v1927_v36  ;;  %1263 = vmatmul.mubr.bf16.vlgmr.msra.gmra.mrb[4].mxu1 %v1927_v36  ;;  %v1286_v36 = vrot.slane %v1281_v35, %v1912_v57 }
 0x241   :  { %v1178_v39 = vpop.f32.mrb[4].mxu0  ;;  %v1264_v40 = vpop.f32.mrb[4].mxu1 }
 0x242   :  { %v1512_v41 = vadd.f32 %v1178_v39, %v444_v33  ;;  %v1516_v42 = vadd.f32 %v1264_v40, %v452_v34  ;;  %v1180_v43 = vpop.f32.mrb[5].mxu0  ;;  %v1266_v44 = vpop.f32.mrb[5].mxu1 }
 0x243   :  { %v1513_v45 = vadd.f32 %v1180_v43, %v448_v37  ;;  %v1517_v47 = vadd.f32 %v1266_v44, %v456_v38  ;;  %v1182_v48 = vpop.f32.mrb[6].mxu0  ;;  %v1268_v49 = vpop.f32.mrb[6].mxu1 }
 0x244   :  { %v1273_v50 = vmax.f32 %v1512_v41, 0.0  ;;  %v1514_v52 = vadd.f32 %v1182_v48, %v444_v33  ;;  %v1518_v53 = vadd.f32 %v1268_v49, %v452_v34  ;;  %v1184_v54 = vpop.f32.mrb[7].mxu0  ;;  %v1270_v55 = vpop.f32.mrb[7].mxu1  ;;  %v1275_v56 = vmax.f32 %v1516_v42, 0.0 }
 0x245   :  { %v1274_v58 = vmax.f32 %v1513_v45, 0.0  ;;  %v1515_v60 = vadd.f32 %v1184_v54, %v448_v37  ;;  %v1519_v57 = vadd.f32 %v1270_v55, %v456_v38  ;;  %v1276_v59 = vmax.f32 %v1517_v47, 0.0 }
 0x246   :  { %v1303_v62 = vmul.f32 %v1286_v36, %v1273_v50  ;;  %v1277_v63 = vmax.f32 %v1514_v52, 0.0  ;;  %v1279_v4 = vmax.f32 %v1518_v53, 0.0  ;;  %v1305_v7 = vmul.f32 %v1294_v51, %v1275_v56 }
 0x247   :  { %v1304_v3 = vmul.f32 %v1290_v46, %v1274_v58  ;;  %v1278_v5 = vmax.f32 %v1515_v60, 0.0  ;;  %v1280_v61 = vmax.f32 %v1519_v57, 0.0  ;;  %v1306_v11 = vmul.f32 %v1298_v2, %v1276_v59 }
 0x248   :  { %v1307_v6 = vmul.f32 %v1286_v36, %v1277_v63  ;;  %v1309_v9 = vmul.f32 %v1294_v51, %v1279_v4 }
 0x249   :  { %v1308_v1 = vmul.f32 %v1290_v46, %v1278_v5  ;;  %v1311_v8 = vadd.f32 %v1304_v3, %v1303_v62  ;;  %v1310_v13 = vmul.f32 %v1298_v2, %v1280_v61 }
 0x24b   :  { %v1316_v10 = vadd.f32 %v1308_v1, %v1307_v6  ;;  %v1312_v12 = vadd.f32 %v1311_v8, %v1305_v7 }
 0x24d   :  { %v1313_v14 = vadd.f32 %v1312_v12, %v1306_v11  ;;  %v1317_v15 = vadd.f32 %v1316_v10, %v1309_v9 }
 0x24f   :  { %1314 = vadd.xlane.f32.xlu0 %v1313_v14  ;;  %v1318_v16 = vadd.f32 %v1317_v15, %v1310_v13 }
 0x253   :  { %1319 = vadd.xlane.f32.xlu0 %v1318_v16 }
 0x2dc   :  { %v1315_v17 = vpop.xlane.xlu0 %1314 }
 0x2dd   :  { %v1328_v18 = vadd.f32 %v1475_v0, %v1315_v17 }
 0x2df   :  { %1331 = vst.msk [vmem:[%s1958_s7] sm:$0xff] %vm1330_vm4, %v1328_v18 }
 0x2e0   :  { %v1320_v19 = vpop.xlane.xlu0 %1319 }
 0x2e1   :  { %v1329_v20 = vadd.f32 %v1475_v0, %v1320_v19 }
 0x2e3   :  { %1332 = vst.msk [vmem:[%s1958_s7 + $0x8] sm:$0xff] %vm1330_vm4, %v1329_v20 }
 0x2e4   :  { %1337 = vsyncpa [#allocation4], 1 }
 0x2e5   :  { %1338 = vsyncpa [#allocation6], 1 }

</bundles_post_ra>
